<compile_context>
chip_gen: v7x
topology: tpu7x:2x2x1
jax: 0.10.0
libtpu: 0.0.40
codegen_flags: <defaults>
</compile_context>

<pallas_src>
import functools

import jax
import jax.numpy as jnp
from jax import lax
from jax.experimental import pallas as pl
from jax.experimental.pallas import tpu as pltpu

_LANES = 128       # all layer widths (d0, d1, act, 4H) must be <= 128 here
_ROW_ALIGN = 16    # slab blocks 16-row aligned -> tile-aligned for bf16 (16,128)
_VMEM = pl.BlockSpec(memory_space=pltpu.MemorySpace.VMEM)


def _round_up(n, m):
    return (n + m - 1) // m * m


def _pad2d(a, rows, cols=_LANES):
    r, c = a.shape
    return jnp.pad(a, ((0, rows - r), (0, cols - c)))


# ----------------------------------------------------------------------------
# Packed weight-slab layout (shared by prep, kernels, and references)
# ----------------------------------------------------------------------------
def _mlp_offsets(obs_p):
    blocks = [("w0", obs_p, obs_p), ("b0", 1, _ROW_ALIGN),
              ("w1", _LANES, _LANES), ("b1", 1, _ROW_ALIGN),
              ("w2", _LANES, _LANES), ("b2", 1, _ROW_ALIGN)]
    offs, r = {}, 0
    for name, used, padded in blocks:
        offs[name] = (r, used)
        r += padded
    offs["total_rows"] = r
    return offs


def _lstm_offsets(obs_p, H):
    blocks = [("wcat", obs_p + H, obs_p + H), ("bcat", 1, _ROW_ALIGN),
              ("w0", H, H), ("b0", 1, _ROW_ALIGN),
              ("w1", _LANES, _LANES), ("b1", 1, _ROW_ALIGN),
              ("w2", _LANES, _LANES), ("b2", 1, _ROW_ALIGN)]
    offs, r = {}, 0
    for name, used, padded in blocks:
        offs[name] = (r, used)
        r += padded
    offs["total_rows"] = r
    return offs


def _blk_ref(slab_ref, offs, name):          # in-kernel (Ref) block view/load
    start, rows = offs[name]
    return slab_ref[pl.ds(start, rows), :]


def _blk_arr(slab, offs, name):              # reference (array) block view
    start, rows = offs[name]
    return slab[start:start + rows]


# ----------------------------------------------------------------------------
# Shared math (used by BOTH the Pallas kernels and the plain-JAX references,
# so kernel and reference perform identical arithmetic).
# ----------------------------------------------------------------------------
def _elu(v):
    # torch.nn.ELU(alpha=1.0). exp() form lowers cleanly on all generations.
    # TODO(synk): expm1 would be marginally more precise for tiny negatives.
    return jnp.where(v > 0, v, jnp.exp(jnp.minimum(v, 0.0)) - 1.0)


def _actor_mlp_math(h, w0, b0, w1, b1, w2, b2, wdt):
    f32 = jnp.float32
    h = _elu(jnp.dot(h.astype(wdt), w0, preferred_element_type=f32) + b0.astype(f32))
    h = _elu(jnp.dot(h.astype(wdt), w1, preferred_element_type=f32) + b1.astype(f32))
    return jnp.dot(h.astype(wdt), w2, preferred_element_type=f32) + b2.astype(f32)


def _lstm_cell_math(x_f32, h_f32, c_f32, wcat, bcat, H, wdt):
    f32 = jnp.float32
    # single fused gate matmul: [x | h] @ [w_ih ; w_hh] + (b_ih + b_hh)
    xh = jnp.concatenate([x_f32, h_f32], axis=1).astype(wdt)
    gates = jnp.dot(xh, wcat, preferred_element_type=f32) + bcat.astype(f32)
    # torch gate order [i, f, g, o]: two full-width EUP passes, slice after
    # (instead of four 32-lane sliced transcendentals).
    sig = jax.nn.sigmoid(gates)
    tah = jnp.tanh(gates)
    i_g = sig[:, 0 * H:1 * H]
    f_g = sig[:, 1 * H:2 * H]
    g_g = tah[:, 2 * H:3 * H]
    o_g = sig[:, 3 * H:4 * H]
    c_new = f_g * c_f32 + i_g * g_g
    h_new = o_g * jnp.tanh(c_new)
    return h_new, c_new


# ----------------------------------------------------------------------------
# Kernels
# ----------------------------------------------------------------------------
def _mlp_actor_kernel(x_ref, slab_ref, out_ref, *, obs_p):
    offs = _mlp_offsets(obs_p)
    g = lambda n: _blk_ref(slab_ref, offs, n)
    y = _actor_mlp_math(x_ref[...], g("w0"), g("b0"), g("w1"), g("b1"),
                        g("w2"), g("b2"), slab_ref.dtype)
    out_ref[...] = y.astype(out_ref.dtype)          # one lane-dense (tb,128) store


def _lstm_actor_step(x_f32, h_f32, c_f32, slab_ref, obs_p, H):
    offs = _lstm_offsets(obs_p, H)
    g = lambda n: _blk_ref(slab_ref, offs, n)
    h_new, c_new = _lstm_cell_math(x_f32, h_f32, c_f32, g("wcat"), g("bcat"),
                                   H, slab_ref.dtype)
    y = _actor_mlp_math(h_new, g("w0"), g("b0"), g("w1"), g("b1"),
                        g("w2"), g("b2"), slab_ref.dtype)
    return h_new, c_new, y


def _lstm_actor_kernel(x_ref, h_ref, c_ref, slab_ref, out_ref, *, obs_p, H):
    h_new, c_new, y = _lstm_actor_step(x_ref[...], h_ref[...], c_ref[...],
                                       slab_ref, obs_p, H)
    # one unmasked full-width store of the fused [h | c | action(+pad)] slab
    out_ref[...] = jnp.concatenate(
        [h_new, c_new, y[:, : _LANES - 2 * H]], axis=1).astype(out_ref.dtype)


def _lstm_rollout_kernel(x_ref, h0_ref, c0_ref, slab_ref, act_ref, hc_ref,
                         h_s, c_s, *, obs_p, H, Tc, T):
    g = pl.program_id(0)

    @pl.when(g == 0)
    def _():
        h_s[...] = h0_ref[...]
        c_s[...] = c0_ref[...]

    ragged = (T % Tc) != 0        # static: only the last chunk can be ragged

    def body(step, carry):
        h_new, c_new, y = _lstm_actor_step(x_ref[step], h_s[...], c_s[...],
                                           slab_ref, obs_p, H)
        if ragged:
            # guard garbage timesteps of the padded trailing chunk so they
            # never contaminate the carried state (their output rows are
            # dropped by the partial-block writeback anyway).
            valid = (g * Tc + step) < T
            h_new = jnp.where(valid, h_new, h_s[...])
            c_new = jnp.where(valid, c_new, c_s[...])
        h_s[...] = h_new
        c_s[...] = c_new
        act_ref[step] = y.astype(act_ref.dtype)     # lane-dense 128-wide store
        return carry

    lax.fori_loop(0, Tc, body, 0, unroll=True)
    # final h/c only (small f32 side output, written back once at grid end)
    hc_ref[...] = jnp.concatenate([h_s[...], c_s[...]], axis=1)


# ----------------------------------------------------------------------------
# Parameter preparation: fold normalizer, fuse LSTM weights, pack one slab
# ----------------------------------------------------------------------------
def prepare_mlp_params(mean, std, w0, b0, w1, b1, w2, b2, *,
                       eps=1e-5, wdtype=jnp.bfloat16):
    obs, d0 = w0.shape
    d1, act = w1.shape[1], w2.shape[1]
    assert max(d0, d1, act) <= _LANES
    inv = 1.0 / (std + eps)
    # TODO(synk): if any std is tiny, the folded rows/bias may lose precision
    # in bf16; keep a separate f32 bias slab in that regime.
    w0f = w0 * inv[:, None]                    # fold (x - mean)/(std+eps) into layer 0
    b0f = b0 - (mean * inv) @ w0
    obs_p = _round_up(obs, _ROW_ALIGN)
    offs = _mlp_offsets(obs_p)
    slab = jnp.concatenate([
        _pad2d(w0f, obs_p), _pad2d(b0f[None, :], _ROW_ALIGN),
        _pad2d(w1, _LANES), _pad2d(b1[None, :], _ROW_ALIGN),
        _pad2d(w2, _LANES), _pad2d(b2[None, :], _ROW_ALIGN),
    ], axis=0).astype(wdtype)
    assert slab.shape == (offs["total_rows"], _LANES)
    return slab, dict(obs=obs, obs_p=obs_p, act=act)


def prepare_lstm_params(mean, std, w_ih, w_hh, b_ih, b_hh,
                        w0, b0, w1, b1, w2, b2, *, eps=1e-5, wdtype=jnp.bfloat16):
    obs, G = w_ih.shape
    H = w_hh.shape[0]
    d0, d1, act = w0.shape[1], w1.shape[1], w2.shape[1]
    assert G == 4 * H and G <= _LANES
    assert H % _ROW_ALIGN == 0                       # keeps slab blocks tile-aligned
    assert w0.shape[0] == H and max(d0, d1) <= _LANES
    assert 2 * H < _LANES and act <= _LANES - 2 * H  # fused [h|c|act] output fits
    inv = 1.0 / (std + eps)
    w_ihf = w_ih * inv[:, None]                      # fold normalizer into input weights
    b_cat = b_ih + b_hh - (mean * inv) @ w_ih        # fused LSTM bias
    obs_p = _round_up(obs, _ROW_ALIGN)
    wcat = jnp.zeros((obs_p + H, _LANES), jnp.float32)
    wcat = wcat.at[:obs, :G].set(w_ihf)
    wcat = wcat.at[obs_p:obs_p + H, :G].set(w_hh)
    offs = _lstm_offsets(obs_p, H)
    slab = jnp.concatenate([
        wcat, _pad2d(b_cat[None, :], _ROW_ALIGN),
        _pad2d(w0, H), _pad2d(b0[None, :], _ROW_ALIGN),
        _pad2d(w1, _LANES), _pad2d(b1[None, :], _ROW_ALIGN),
        _pad2d(w2, _LANES), _pad2d(b2[None, :], _ROW_ALIGN),
    ], axis=0).astype(wdtype)
    assert slab.shape == (offs["total_rows"], _LANES)
    return slab, dict(obs=obs, obs_p=obs_p, H=H, act=act)


# ----------------------------------------------------------------------------
# Wrappers
# ----------------------------------------------------------------------------
def mlp_forward(x, slab, meta, *, block_b=1024):
    """Non-recurrent forward: actor(normalizer(x)).  x: (B, obs) -> (B, act)."""
    obs, obs_p, act = meta["obs"], meta["obs_p"], meta["act"]
    B = x.shape[0]
    x = x.astype(jnp.float32)
    if obs != obs_p:                       # demo: obs == obs_p -> no wrapper copy
        x = jnp.pad(x, ((0, 0), (0, obs_p - obs)))
    tb = min(block_b, _round_up(B, 16))
    if B >= 32:                            # v7x: keep >= 2 "parallel" grid steps
        tb = min(tb, _round_up(pl.cdiv(B, 2), 16))
    out = pl.pallas_call(
        functools.partial(_mlp_actor_kernel, obs_p=obs_p),
        out_shape=jax.ShapeDtypeStruct((B, _LANES), jnp.bfloat16),
        grid=(pl.cdiv(B, tb),),
        in_specs=[pl.BlockSpec((tb, obs_p), lambda i: (i, 0)),
                  pl.BlockSpec(slab.shape, lambda i: (0, 0))],   # resident slab
        out_specs=pl.BlockSpec((tb, _LANES), lambda i: (i, 0)),
        compiler_params=pltpu.CompilerParams(dimension_semantics=("parallel",)),
    )(x, slab)
    return out[:, :act].astype(jnp.float32)


def lstm_forward(x, hidden_state, cell_state, slab, meta):
    """One LSTM step + actor.  x: (B, obs); hidden/cell: (1, B, H).
    Returns (action, new_hidden_state, new_cell_state)."""
    # TODO(synk): only num_layers == 1 is supported; multi-layer LSTM and the
    # GRU variant (forward_gru) would need a per-layer loop / 3-gate kernel.
    # TODO(synk): a cross-call prefetch (semaphore+VMEM outputs) could hide the
    # slab HBM->VMEM DMA of this single-step path across control steps.
    obs, obs_p, H, act = meta["obs"], meta["obs_p"], meta["H"], meta["act"]
    x = x.astype(jnp.float32)
    if obs != obs_p:
        x = jnp.pad(x, ((0, 0), (0, obs_p - obs)))
    h = hidden_state[0].astype(jnp.float32)
    c = cell_state[0].astype(jnp.float32)
    out = pl.pallas_call(
        functools.partial(_lstm_actor_kernel, obs_p=obs_p, H=H),
        out_shape=jax.ShapeDtypeStruct((x.shape[0], _LANES), jnp.float32),
        in_specs=[_VMEM, _VMEM, _VMEM, _VMEM],
        out_specs=_VMEM,
    )(x, h, c, slab)
    action = out[:, 2 * H:2 * H + act]
    return action, out[:, 0:H][None], out[:, H:2 * H][None]


def lstm_rollout(x_seq, hidden_state, cell_state, slab, meta, *, time_chunk=8):
    """T LSTM steps + actor inside ONE pallas_call: time axis chunked Tc steps
    per sequential grid step, weights resident in VMEM, h/c carried in VMEM
    scratch.  x_seq: (T, B, obs) time-major.
    Returns (actions (T,B,act), h_T (1,B,H), c_T (1,B,H))."""
    # TODO(synk): for v7x a leading "parallel" batch grid axis (time innermost,
    # per-core h/c scratch) would use both TensorCores; batch=1 here.
    obs, obs_p, H, act = meta["obs"], meta["obs_p"], meta["H"], meta["act"]
    T, B = x_seq.shape[0], x_seq.shape[1]
    x = x_seq.astype(jnp.float32)
    if obs != obs_p:
        x = jnp.pad(x, ((0, 0), (0, 0), (0, obs_p - obs)))
    h0 = hidden_state[0].astype(jnp.float32)
    c0 = cell_state[0].astype(jnp.float32)
    Tc = T if T <= time_chunk else time_chunk
    acts, hc = pl.pallas_call(
        functools.partial(_lstm_rollout_kernel, obs_p=obs_p, H=H, Tc=Tc, T=T),
        out_shape=(jax.ShapeDtypeStruct((T, B, _LANES), jnp.bfloat16),
                   jax.ShapeDtypeStruct((B, 2 * H), jnp.float32)),
        grid=(pl.cdiv(T, Tc),),
        in_specs=[pl.BlockSpec((Tc, B, obs_p), lambda t: (t, 0, 0)),
                  pl.BlockSpec((B, H), lambda t: (0, 0)),
                  pl.BlockSpec((B, H), lambda t: (0, 0)),
                  pl.BlockSpec(slab.shape, lambda t: (0, 0))],   # resident slab
        out_specs=(pl.BlockSpec((Tc, B, _LANES), lambda t: (t, 0, 0)),
                   pl.BlockSpec((B, 2 * H), lambda t: (0, 0))),
        scratch_shapes=[pltpu.VMEM((B, H), jnp.float32),
                        pltpu.VMEM((B, H), jnp.float32)],
        compiler_params=pltpu.CompilerParams(dimension_semantics=("arbitrary",)),
    )(x, h0, c0, slab)
    actions = acts[:, :, :act].astype(jnp.float32)
    h_T = hc[:, 0:H][None]
    c_T = hc[:, H:2 * H][None]
    return actions, h_T, c_T


def reset_memory(hidden_state, cell_state):
    """Functional analogue of reset_memory(): zero the recurrent buffers."""
    return jnp.zeros_like(hidden_state), jnp.zeros_like(cell_state)


# ----------------------------------------------------------------------------
# Plain-JAX references (same slab, same shared math)
# ----------------------------------------------------------------------------
def _ref_mlp_forward(x, slab, meta):
    obs, obs_p, act = meta["obs"], meta["obs_p"], meta["act"]
    offs = _mlp_offsets(obs_p)
    g = lambda n: _blk_arr(slab, offs, n)
    xp = jnp.zeros((x.shape[0], obs_p), jnp.float32).at[:, :obs].set(x)
    y = _actor_mlp_math(xp, g("w0"), g("b0"), g("w1"), g("b1"), g("w2"), g("b2"),
                        slab.dtype)
    return y[:, :act]


def _ref_lstm_step(x, h, c, slab, meta):
    obs, obs_p, H, act = meta["obs"], meta["obs_p"], meta["H"], meta["act"]
    offs = _lstm_offsets(obs_p, H)
    g = lambda n: _blk_arr(slab, offs, n)
    xp = jnp.zeros((x.shape[0], obs_p), jnp.float32).at[:, :obs].set(x)
    h_new, c_new = _lstm_cell_math(xp, h, c, g("wcat"), g("bcat"), H, slab.dtype)
    y = _actor_mlp_math(h_new, g("w0"), g("b0"), g("w1"), g("b1"), g("w2"), g("b2"),
                        slab.dtype)
    return y[:, :act], h_new, c_new


# ----------------------------------------------------------------------------
# Deterministic raw parameters (torch layout transposed: weights are (in, out))
# ----------------------------------------------------------------------------
def _make_raw_params(key, obs_dim, hidden_dims, act_dim, rnn_hidden):
    ks = jax.random.split(key, 12)
    d0, d1 = hidden_dims
    s = 0.1
    w = lambda k, shp: (s * jax.random.normal(k, shp)).astype(jnp.float32)
    return dict(
        mean=w(ks[0], (obs_dim,)),
        std=jnp.abs(w(ks[1], (obs_dim,))) + 1.0,
        # actor MLP (actor input = obs_dim = rnn_hidden in this demo)
        w0=w(ks[2], (rnn_hidden, d0)), b0=w(ks[3], (d0,)),
        w1=w(ks[4], (d0, d1)),         b1=w(ks[5], (d1,)),
        w2=w(ks[6], (d1, act_dim)),    b2=w(ks[7], (act_dim,)),
        # LSTM (num_layers = 1), gate order [i, f, g, o]
        w_ih=w(ks[8], (obs_dim, 4 * rnn_hidden)),
        w_hh=w(ks[9], (rnn_hidden, 4 * rnn_hidden)),
        b_ih=w(ks[10], (4 * rnn_hidden,)),
        b_hh=w(ks[11], (4 * rnn_hidden,)),
    )


if __name__ == "__main__":
    obs_dim, hidden_dims, act_dim, rnn_hidden = 32, (32, 32), 8, 32
    key = jax.random.PRNGKey(0)
    kp, kx, kx1, kseq = jax.random.split(key, 4)

    # obs_dim == rnn_hidden so the same actor weights serve both paths, like
    # the exporter reusing policy.actor for recurrent and non-recurrent cases.
    p = _make_raw_params(kp, obs_dim, hidden_dims, act_dim, rnn_hidden)

    mlp_slab, mlp_meta = prepare_mlp_params(
        p["mean"], p["std"], p["w0"], p["b0"], p["w1"], p["b1"], p["w2"], p["b2"])
    lstm_slab, lstm_meta = prepare_lstm_params(
        p["mean"], p["std"], p["w_ih"], p["w_hh"], p["b_ih"], p["b_hh"],
        p["w0"], p["b0"], p["w1"], p["b1"], p["w2"], p["b2"])

    fwd = jax.jit(lambda xb, s: mlp_forward(xb, s, mlp_meta))
    step = jax.jit(lambda xb, h, c, s: lstm_forward(xb, h, c, s, lstm_meta))
    roll = jax.jit(lambda xs, h, c, s: lstm_rollout(xs, h, c, s, lstm_meta))

    # ---- non-recurrent path: forward(x) = actor(normalizer(x)), batched ----
    B = 128   # batch many environments per call (the single largest lever)
    x = jax.random.normal(kx, (B, obs_dim), dtype=jnp.float32)
    y = jax.block_until_ready(fwd(x, mlp_slab))
    y_ref = _ref_mlp_forward(x, mlp_slab, mlp_meta)
    assert y.shape == (B, act_dim)
    assert jnp.allclose(y, y_ref, atol=2e-3, rtol=1e-2), float(jnp.abs(y - y_ref).max())

    # ---- recurrent LSTM path: single-step forward_lstm with state carry ----
    h0 = jnp.zeros((1, 1, rnn_hidden), jnp.float32)   # buffer 'hidden_state'
    c0 = jnp.zeros((1, 1, rnn_hidden), jnp.float32)   # buffer 'cell_state'
    x1 = jax.random.normal(kx1, (1, obs_dim), dtype=jnp.float32)

    a1, h1, c1 = step(x1, h0, c0, lstm_slab)
    a2, h2, c2 = step(x1, h1, c1, lstm_slab)
    jax.block_until_ready((a1, h1, c1, a2, h2, c2))

    a1_r, h1_r, c1_r = _ref_lstm_step(x1, h0[0], c0[0], lstm_slab, lstm_meta)
    a2_r, h2_r, c2_r = _ref_lstm_step(x1, h1_r, c1_r, lstm_slab, lstm_meta)
    assert a1.shape == (1, act_dim) and h1.shape == (1, 1, rnn_hidden)
    for got, ref in ((a1, a1_r), (h1, h1_r[None]), (c1, c1_r[None]),
                     (a2, a2_r), (h2, h2_r[None]), (c2, c2_r[None])):
        assert jnp.allclose(got, ref, atol=2e-3, rtol=1e-2), \
            float(jnp.abs(got - ref).max())

    # ---- recurrent LSTM path: T-step rollout in one pallas_call ----
    # T=20 with time_chunk=8 -> grid=(3,): exercises h/c carry across grid
    # steps AND the ragged trailing chunk guard.
    T = 20
    x_seq = jax.random.normal(kseq, (T, 1, obs_dim), dtype=jnp.float32)
    acts, hT, cT = jax.block_until_ready(roll(x_seq, h0, c0, lstm_slab))
    h_r, c_r = h0[0], c0[0]
    acts_r = []
    for t in range(T):
        a_r, h_r, c_r = _ref_lstm_step(x_seq[t], h_r, c_r, lstm_slab, lstm_meta)
        acts_r.append(a_r)
    acts_r = jnp.stack(acts_r, axis=0)
    assert acts.shape == (T, 1, act_dim)
    assert jnp.allclose(acts, acts_r, atol=2e-3, rtol=1e-2), \
        float(jnp.abs(acts - acts_r).max())
    assert jnp.allclose(hT, h_r[None], atol=2e-3, rtol=1e-2)
    assert jnp.allclose(cT, c_r[None], atol=2e-3, rtol=1e-2)

    # ---- reset_memory() ----
    hr, cr = reset_memory(h2, c2)
    assert float(jnp.abs(hr).sum()) == 0.0 and float(jnp.abs(cr).sum()) == 0.0

    # TODO(synk): GRU variant (forward_gru) and multi-layer LSTM not
    # implemented (same structure: 3 gates / per-layer loop).
    print("KERNEL_OK")
</pallas_src>

<mosaic_0001>
module attributes {stable_mosaic.version = 11 : i64} {
  func.func @_mlp_actor_kernel(%arg0: i32, %arg1: memref<64x32xf32, #tpu.memory_space<vmem>>, %arg2: memref<336x128xbf16, #tpu.memory_space<vmem>>, %arg3: memref<64x128xbf16, #tpu.memory_space<vmem>>) attributes {dimension_semantics = [#tpu.dimension_semantics<parallel>], iteration_bounds = array<i64: 2>, scalar_prefetch = 0 : i64, scratch_operands = 0 : i64, tpu.core_type = #tpu.core_type<tc>, window_params = [{transform_indices = @transform_0, window_bounds = array<i64: 64, 32>}, {pipeline_mode = #tpu.pipeline_mode<synchronous>, transform_indices = @transform_1, window_bounds = array<i64: 336, 128>}, {transform_indices = @transform_2, window_bounds = array<i64: 64, 128>}]} {
    %c0 = arith.constant 0 : index
    %c0_0 = arith.constant 0 : index
    %0 = vector.load %arg1[%c0, %c0_0] : memref<64x32xf32, #tpu.memory_space<vmem>>, vector<64x32xf32>
    %c0_1 = arith.constant 0 : index
    %c0_2 = arith.constant 0 : index
    %1 = vector.load %arg2[%c0_1, %c0_2] : memref<336x128xbf16, #tpu.memory_space<vmem>>, vector<32x128xbf16>
    %c32 = arith.constant 32 : index
    %c0_3 = arith.constant 0 : index
    %2 = vector.load %arg2[%c32, %c0_3] : memref<336x128xbf16, #tpu.memory_space<vmem>>, vector<1x128xbf16>
    %c48 = arith.constant 48 : index
    %c0_4 = arith.constant 0 : index
    %3 = vector.load %arg2[%c48, %c0_4] : memref<336x128xbf16, #tpu.memory_space<vmem>>, vector<128x128xbf16>
    %c176 = arith.constant 176 : index
    %c0_5 = arith.constant 0 : index
    %4 = vector.load %arg2[%c176, %c0_5] : memref<336x128xbf16, #tpu.memory_space<vmem>>, vector<1x128xbf16>
    %c192 = arith.constant 192 : index
    %c0_6 = arith.constant 0 : index
    %5 = vector.load %arg2[%c192, %c0_6] : memref<336x128xbf16, #tpu.memory_space<vmem>>, vector<128x128xbf16>
    %c320 = arith.constant 320 : index
    %c0_7 = arith.constant 0 : index
    %6 = vector.load %arg2[%c320, %c0_7] : memref<336x128xbf16, #tpu.memory_space<vmem>>, vector<1x128xbf16>
    %7 = arith.truncf %0 : vector<64x32xf32> to vector<64x32xbf16>
    %cst = arith.constant dense<0.000000e+00> : vector<64x128xf32>
    %8 = tpu.matmul %7, %1, %cst {dimension_numbers = #tpu.dot_dimension_numbers<[1], [0], [0], [1], [0, 0, 1, 1], [], []>} : vector<64x32xbf16>, vector<32x128xbf16>, vector<64x128xf32> -> vector<64x128xf32>
    %9 = arith.extf %2 : vector<1x128xbf16> to vector<1x128xf32>
    %10 = vector.broadcast %9 : vector<1x128xf32> to vector<64x128xf32>
    %11 = arith.addf %8, %10 : vector<64x128xf32>
    %cst_8 = arith.constant 0.000000e+00 : f32
    %12 = vector.broadcast %cst_8 : f32 to vector<64x128xf32>
    %13 = arith.cmpf ogt, %11, %12 : vector<64x128xf32>
    %cst_9 = arith.constant 0.000000e+00 : f32
    %14 = vector.broadcast %cst_9 : f32 to vector<64x128xf32>
    %15 = arith.minimumf %11, %14 : vector<64x128xf32>
    %16 = math.exp %15 : vector<64x128xf32>
    %cst_10 = arith.constant 1.000000e+00 : f32
    %17 = vector.broadcast %cst_10 : f32 to vector<64x128xf32>
    %18 = arith.subf %16, %17 : vector<64x128xf32>
    %19 = arith.select %13, %11, %18 : vector<64x128xi1>, vector<64x128xf32>
    %20 = arith.truncf %19 : vector<64x128xf32> to vector<64x128xbf16>
    %cst_11 = arith.constant dense<0.000000e+00> : vector<64x128xf32>
    %21 = tpu.matmul %20, %3, %cst_11 {dimension_numbers = #tpu.dot_dimension_numbers<[1], [0], [0], [1], [0, 0, 1, 1], [], []>} : vector<64x128xbf16>, vector<128x128xbf16>, vector<64x128xf32> -> vector<64x128xf32>
    %22 = arith.extf %4 : vector<1x128xbf16> to vector<1x128xf32>
    %23 = vector.broadcast %22 : vector<1x128xf32> to vector<64x128xf32>
    %24 = arith.addf %21, %23 : vector<64x128xf32>
    %cst_12 = arith.constant 0.000000e+00 : f32
    %25 = vector.broadcast %cst_12 : f32 to vector<64x128xf32>
    %26 = arith.cmpf ogt, %24, %25 : vector<64x128xf32>
    %cst_13 = arith.constant 0.000000e+00 : f32
    %27 = vector.broadcast %cst_13 : f32 to vector<64x128xf32>
    %28 = arith.minimumf %24, %27 : vector<64x128xf32>
    %29 = math.exp %28 : vector<64x128xf32>
    %cst_14 = arith.constant 1.000000e+00 : f32
    %30 = vector.broadcast %cst_14 : f32 to vector<64x128xf32>
    %31 = arith.subf %29, %30 : vector<64x128xf32>
    %32 = arith.select %26, %24, %31 : vector<64x128xi1>, vector<64x128xf32>
    %33 = arith.truncf %32 : vector<64x128xf32> to vector<64x128xbf16>
    %cst_15 = arith.constant dense<0.000000e+00> : vector<64x128xf32>
    %34 = tpu.matmul %33, %5, %cst_15 {dimension_numbers = #tpu.dot_dimension_numbers<[1], [0], [0], [1], [0, 0, 1, 1], [], []>} : vector<64x128xbf16>, vector<128x128xbf16>, vector<64x128xf32> -> vector<64x128xf32>
    %35 = arith.extf %6 : vector<1x128xbf16> to vector<1x128xf32>
    %36 = vector.broadcast %35 : vector<1x128xf32> to vector<64x128xf32>
    %37 = arith.addf %34, %36 : vector<64x128xf32>
    %38 = arith.truncf %37 : vector<64x128xf32> to vector<64x128xbf16>
    %c0_16 = arith.constant 0 : index
    %c0_17 = arith.constant 0 : index
    %39 = vector.load %arg3[%c0_16, %c0_17] : memref<64x128xbf16, #tpu.memory_space<vmem>>, vector<64x128xbf16>
    tpu.vector_store %arg3[%c0_16, %c0_17], %38 {strides = array<i32>} : memref<64x128xbf16, #tpu.memory_space<vmem>>, vector<64x128xbf16>,
    return
  }
  func.func @transform_0(%arg0: i32) -> (i32, i32) {
    %c0_i32 = arith.constant 0 : i32
    %c0_i32_0 = arith.constant 0 : i32
    return %arg0, %c0_i32 : i32, i32
  }
  func.func @transform_1(%arg0: i32) -> (i32, i32) {
    %c0_i32 = arith.constant 0 : i32
    %c0_i32_0 = arith.constant 0 : i32
    %c0_i32_1 = arith.constant 0 : i32
    return %c0_i32, %c0_i32_0 : i32, i32
  }
  func.func @transform_2(%arg0: i32) -> (i32, i32) {
    %c0_i32 = arith.constant 0 : i32
    %c0_i32_0 = arith.constant 0 : i32
    return %arg0, %c0_i32 : i32, i32
  }
}

</mosaic_0001>

<bundles_post_ra>
// kernel: _lambda_.1
= control target key start
LH: loop header
LB: loop body
LE: loop exit
PB: predicated region body
PF: predicated region fallthrough
CT: control target
= control target key end

     0   :  { %7 = vsyncpa [#allocation3], 0  ;;  %s1066_s9 = smov 0   ;;  %s1138_s0 = inlined_call_operand.vmem [shape: f32[128,32], index: 0, kind: input, shape index: {}]   ;;  %s1139_s1 = inlined_call_operand.hbm [shape: bf16[336,128], index: 1, kind: input, shape index: {}]   ;;  %s1140_s2 = inlined_call_operand.vmem [shape: bf16[128,128], index: 2, kind: output, shape index: {}]  }
   0x1 LB: > { %s757_s10 = sadd.s32 4294967295, %s1046_s9   ;;  %p759_p0 = scmp.ge.s32.totalorder %s1046_s9, 1  ;;  %s1046_s9 = sphi %s1066_s9, %s13_s9  }
   0x2   : > { %p91_p1 = scmp.lt.s32.totalorder %s1046_s9, 3  ;;  %s1048_s11 = smov [#allocation2]  }
   0x3   : > { %s103_s12 = sshll.u32 %s1048_s11, 4  ;;  %p1080_p3 = scmp.eq.s32.totalorder %s757_s10, 0  ;;  %s104_s12 = int_to_ptr.vmem [resolvable:$true] %s103_s12 }
   0x4   : > { %p1074_p2 = pnand %p759_p0, %p91_p1  ;;  %s1008_s18 = scalar_lea.hbm %s1139_s1, 2688 }
   0x5   : > { %s1145_s14 = scalar_select %p1080_p3, 1, 0 }
   0x6   : > { %s1144_s13 = scalar_select %p1074_p2, 1, 0 }
   0x7   : > { %p941_p4 = pneg %p1074_p2  ;;  %p1009_p6 = scmp.ne.s32.totalorder %s1139_s1, %s1008_s18 }
   0x8   : > { %p1015_p10 = scmp.lt.u32.totalorder %s1008_s18, %s1139_s1 }
   0x9   : > { %p1088_p5 = pnand %p1080_p3, %p941_p4 }
   0xb   : > { %p1010_p7 = pneg %p1088_p5 }
   0xd   : > { %p1011_p8 = pnand %p1010_p7, %p1009_p6 }
   0xf   : > { %p1012_p9 = pneg %p1011_p8 }
  0x11   : > { %p1017_p11 = pnand %p1015_p10, %p1012_p9 }
  0x13   : > { %1020 = shalt.err (!%p1017_p11)
}
  0x14   : > { %s1021_s23 = scalar_lea.vmem %s104_s12, 2688  ;;  %p1029_p1 = scmp.lt.s32.totalorder %s104_s12, %s104_s12 }
  0x15   : > { %p1022_p12 = scmp.ne.s32.totalorder %s104_s12, %s1021_s23  ;;  %p1030_p4 = scmp.lt.s32.totalorder %s1021_s23, %s1021_s23 }
  0x17   : > { %p1024_p13 = pnand %p1022_p12, %p1010_p7  ;;  %p1031_p3 = por %p1030_p4, %p1029_p1 }
  0x19   : > { %p1025_p0 = pneg %p1024_p13 }
  0x1b   : > { %p1032_p2 = pnand %p1031_p3, %p1025_p0 }
  0x1d   : > { %1035 = shalt.err (!%p1032_p2)
}
  0x1e   : > { %s1049_s24 = smov 64   ;;  %s1050_s25 = smov 4  }
  0x1f   : > { %944 = dma.hbm_to_vmem [thread:$0]  (!%p1088_p5), %s1139_s1, 2688, %s104_s12, [#allocation3], %s1049_s24, %s1049_s24, %s1050_s25  }
  0x20   : > { %p1147_p6 = scmp.ne.s32.totalorder %s1144_s13, 0 }
  0x21   : > { %p1148_p8 = scmp.ne.s32.totalorder (!%p1147_p6), %s1145_s14, 0 }
  0x22   : > { %128 = sbr.rel (%p1147_p6) target bundleno = 756 (0x2f4), region = 28 }
  0x29   : > { %1041 = dma.done.wait (%p1148_p8), [#allocation3], 2688  }
  0x2a   : > { %1043 = vsyncadd (%p1148_p8), [#allocation3], 4294964608  ;;  %s764_s28 = sshll.u32 %s757_s10, 3  ;;  %v958_v0 = vld [vmem:[#allocation2] sm:$0xff]   ;;  %v959_v1 = vld [vmem:[#allocation2 + $0x8] sm:$0xff]   ;;  %vm231_vm0 = vcmask 261120   ;;  %v215_v24 = vlaneseq }
  0x2b   : > { %p151_p2 = scmp.lt.s32.totalorder %s764_s28, 15  ;;  %877 = vmatprep.subr.bf16.mxu0 %v958_v0  ;;  %v960_v9 = vld [vmem:[#allocation2 + $0x18] sm:$0xff]   ;;  %v961_v11 = vld [vmem:[#allocation2 + $0x20] sm:$0xff]   ;;  %v962_v16 = vld [vmem:[#allocation2 + $0x28] sm:$0xff]  }
  0x2c   : > { %878 = vmatpush3.bf16.msra.mxu0 %v958_v0  ;;  %889 = vmatprep.subr.bf16.mxu1 %v960_v9  ;;  %v963_v17 = vld [vmem:[#allocation2 + $0x30] sm:$0xff]   ;;  %v964_v18 = vld [vmem:[#allocation2 + $0x38] sm:$0xff]   ;;  %v965_v19 = vld [vmem:[#allocation2 + $0x40] sm:$0xff]   ;;  %v216_v25 = vshrl.u32 %v215_v24, 7 }
  0x2d   : > { %s1150_s28 = smov (!%p151_p2, %s764_s28), 15  ;;  %879 = vmatprep.subr.bf16.mxu0 %v959_v1  ;;  %890 = vmatpush3.bf16.msra.mxu1 %v960_v9  ;;  %v966_v20 = vld [vmem:[#allocation2 + $0x48] sm:$0xff]   ;;  %v967_v21 = vld [vmem:[#allocation2 + $0x50] sm:$0xff]   ;;  %v968_v22 = vld [vmem:[#allocation2 + $0x60] sm:$0xff]  }
  0x2e   : > { %s765_s29 = sshll.u32 %s1150_s28, 3  ;;  %891 = vmatprep.subr.bf16.mxu1 %v961_v11  ;;  %v969_v23 = vld [vmem:[#allocation2 + $0x68] sm:$0xff]   ;;  %v175_v26 = vld [vmem:[#allocation2 + $0x10] sm:$0x1]  ;;  %v1126_v28 = vsub.s32 0, %v216_v25  ;;  %s767_s5 = sshll.u32 %s1150_s28, 2 }
  0x2f   : > { %s154_s4 = scalar_lea.vmem %s1138_s0, %s765_s29  ;;  %v214_v27 = vunpack.c.l.bf16 %v175_v26  ;;  %v970_v26 = vld [vmem:[#allocation2 + $0x70] sm:$0xff]   ;;  %s160_s8 = scalar_lea.vmem %s1140_s2, %s767_s5 }
  0x30   : > { %v163_v2 = vld [vmem:[%s154_s4] sm:$0xff]  ;;  %v164_v3 = vld [vmem:[%s154_s4 + $0x8] sm:$0xff]  ;;  %v165_v5 = vld [vmem:[%s154_s4 + $0x10] sm:$0xff]  ;;  %880 = vmatpush3.bf16.msra.mxu0 %v959_v1 }
  0x31   : > { %v210_v4 = vpack.c.bf16 %v164_v3, %v163_v2  ;;  %v166_v6 = vld [vmem:[%s154_s4 + $0x18] sm:$0xff]  ;;  %v167_v7 = vld [vmem:[%s154_s4 + $0x20] sm:$0xff]  ;;  %v168_v8 = vld [vmem:[%s154_s4 + $0x28] sm:$0xff]  ;;  %892 = vmatpush3.bf16.msra.mxu1 %v961_v11  ;;  %913 = vmatprep.subr.bf16.mxu0 %v968_v22  ;;  %v218_v29 = vrot.slane %v214_v27, %v1126_v28 }
  0x32   : > { %v211_v10 = vpack.c.bf16 %v166_v6, %v165_v5  ;;  %v212_v12 = vpack.c.bf16 %v168_v8, %v167_v7  ;;  %v169_v13 = vld [vmem:[%s154_s4 + $0x30] sm:$0xff]  ;;  %v170_v14 = vld [vmem:[%s154_s4 + $0x38] sm:$0xff]  ;;  %893 = vmatprep.subr.bf16.mxu1 %v962_v16 }
  0x33   : > { %881 = vmatprep.mubr.msk.bf16.mxu0 %vm231_vm0, %v210_v4  ;;  %v213_v15 = vpack.c.bf16 %v170_v14, %v169_v13  ;;  %v971_v27 = vld [vmem:[#allocation2 + $0x78] sm:$0xff]  }
  0x34   : > { %882 = vmatmul.mubr.msk.bf16.vlgmr.msra.gmra.mrb[0].mxu0 %vm231_vm0, %v211_v10 }
  0x35   : > { %885 = vmatprep.mubr.msk.bf16.mxu0 %vm231_vm0, %v212_v12  ;;  %894 = vmatpush3.bf16.msra.mxu1 %v962_v16 }
  0x36   : > { %895 = vmatprep.subr.bf16.mxu1 %v963_v17  ;;  %914 = vmatpush3.bf16.msra.mxu0 %v968_v22 }
  0x37   : > { %915 = vmatprep.subr.bf16.mxu0 %v969_v23 }
  0x39   : > { %896 = vmatpush3.bf16.msra.mxu1 %v963_v17 }
  0x3a   : > { %897 = vmatprep.subr.bf16.mxu1 %v964_v18  ;;  %916 = vmatpush3.bf16.msra.mxu0 %v969_v23 }
  0x3b   : > { %917 = vmatprep.subr.bf16.mxu0 %v970_v26 }
  0x3c   : > { %886 = vmatmul.mubr.msk.bf16.gmra.mrb[4].mxu0 %vm231_vm0, %v213_v15 }
  0x3d   : > { %898 = vmatpush3.bf16.msra.mxu1 %v964_v18 }
  0x3e   : > { %899 = vmatprep.subr.bf16.mxu1 %v965_v19  ;;  %918 = vmatpush3.bf16.msra.mxu0 %v970_v26 }
  0x3f   : > { %919 = vmatprep.subr.bf16.mxu0 %v971_v27 }
  0x41   : > { %900 = vmatpush3.bf16.msra.mxu1 %v965_v19 }
  0x42   : > { %901 = vmatprep.subr.bf16.mxu1 %v966_v20  ;;  %920 = vmatpush3.bf16.msra.mxu0 %v971_v27 }
  0x45   : > { %902 = vmatpush3.bf16.msra.mxu1 %v966_v20 }
  0x46   : > { %903 = vmatprep.subr.bf16.mxu1 %v967_v21 }
  0x49   : > { %904 = vmatpush3.bf16.msra.mxu1 %v967_v21 }
 0x107   : > { %v883_v30 = vpop.f32.mrb[0].mxu0 }
 0x108   : > { %v287_v31 = vadd.f32 %v883_v30, %v218_v29  ;;  %v278_v32 = vpop.f32.mrb[1].mxu0  ;;  %v973_v30 = vld [vmem:[#allocation2 + $0x88] sm:$0xff]  }
 0x109   : > { %v279_v33 = vadd.f32 %v278_v32, %v218_v29  ;;  %v884_v34 = vpop.f32.mrb[2].mxu0  ;;  %v975_v32 = vld [vmem:[#allocation2 + $0x98] sm:$0xff]  }
 0x10a   : > { %v319_v35 = vmin.f32 %v287_v31, 0.0  ;;  %v290_v36 = vadd.f32 %v884_v34, %v218_v29  ;;  %v281_v37 = vpop.f32.mrb[3].mxu0  ;;  %vm311_vm1 = vcmp.gt.f32.partialorder %v287_v31, 0.0 }
 0x10b   : > { %v317_v38 = vmin.f32 %v279_v33, 0.0  ;;  %v282_v39 = vadd.f32 %v281_v37, %v218_v29  ;;  %vm309_vm3 = vcmp.gt.f32.partialorder %v279_v33, 0.0 }
 0x10c   : > { %v329_v40 = vmul.f32 1.442695, %v319_v35  ;;  %v320_v41 = vmin.f32 %v290_v36, 0.0  ;;  %vm312_vm2 = vcmp.gt.f32.partialorder %v290_v36, 0.0 }
 0x10d   : > { %v325_v42 = vmul.f32 1.442695, %v317_v38  ;;  %v318_v43 = vmin.f32 %v282_v39, 0.0  ;;  %vm310_vm4 = vcmp.gt.f32.partialorder %v282_v39, 0.0 }
 0x10e   : > { %976 = vpow2.f32 %v329_v40  ;;  %v331_v44 = vmul.f32 1.442695, %v320_v41 }
 0x10f   : > { %978 = vpow2.f32 %v325_v42  ;;  %v327_v45 = vmul.f32 1.442695, %v318_v43  ;;  %v887_v46 = vpop.f32.mrb[4].mxu0 }
 0x110   : > { %980 = vpow2.f32 %v331_v44  ;;  %v303_v47 = vadd.f32 %v887_v46, %v218_v29  ;;  %v294_v48 = vpop.f32.mrb[5].mxu0 }
 0x111   : > { %982 = vpow2.f32 %v327_v45  ;;  %v295_v49 = vadd.f32 %v294_v48, %v218_v29  ;;  %v888_v50 = vpop.f32.mrb[6].mxu0 }
 0x112   : > { %v323_v51 = vmin.f32 %v303_v47, 0.0  ;;  %v306_v52 = vadd.f32 %v888_v50, %v218_v29  ;;  %v297_v53 = vpop.f32.mrb[7].mxu0  ;;  %vm315_vm5 = vcmp.gt.f32.partialorder %v303_v47, 0.0 }
 0x113   : > { %v321_v54 = vmin.f32 %v295_v49, 0.0  ;;  %v298_v55 = vadd.f32 %v297_v53, %v218_v29  ;;  %vm313_vm7 = vcmp.gt.f32.partialorder %v295_v49, 0.0  ;;  %v972_v29 = vld [vmem:[#allocation2 + $0x80] sm:$0xff]  }
 0x114   : > { %v337_v56 = vmul.f32 1.442695, %v323_v51  ;;  %v324_v57 = vmin.f32 %v306_v52, 0.0  ;;  %vm316_vm6 = vcmp.gt.f32.partialorder %v306_v52, 0.0  ;;  %921 = vmatprep.subr.bf16.mxu0 %v972_v29 }
 0x115   : > { %v333_v58 = vmul.f32 1.442695, %v321_v54  ;;  %v322_v59 = vmin.f32 %v298_v55, 0.0  ;;  %vm314_vm8 = vcmp.gt.f32.partialorder %v298_v55, 0.0  ;;  %922 = vmatpush3.bf16.msra.mxu0 %v972_v29 }
 0x116   : > { %984 = vpow2.f32 %v337_v56  ;;  %v339_v60 = vmul.f32 1.442695, %v324_v57  ;;  %923 = vmatprep.subr.bf16.mxu0 %v973_v30 }
 0x117   : > { %986 = vpow2.f32 %v333_v58  ;;  %v335_v61 = vmul.f32 1.442695, %v322_v59 }
 0x118   : > { %v977_v62 = vpop.eup %976  ;;  %988 = vpow2.f32 %v339_v60 }
 0x119   : > { %v979_v63 = vpop.eup %978  ;;  %v776_v0 = vadd.f32 -1.0, %v977_v62  ;;  %990 = vpow2.f32 %v335_v61  ;;  %924 = vmatpush3.bf16.msra.mxu0 %v973_v30 }
 0x11a   : > { %v981_v1 = vpop.eup %980  ;;  %v774_v2 = vadd.f32 -1.0, %v979_v63 }
 0x11b   : > { %v983_v3 = vpop.eup %982  ;;  %v777_v4 = vadd.f32 -1.0, %v981_v1  ;;  %v351_v6 = vsel %vm311_vm1, %v287_v31, %v776_v0  ;;  %v974_v31 = vld [vmem:[#allocation2 + $0x90] sm:$0xff]  }
 0x11c   : > { %v775_v5 = vadd.f32 -1.0, %v983_v3  ;;  %v349_v8 = vsel %vm309_vm3, %v279_v33, %v774_v2  ;;  %925 = vmatprep.subr.bf16.mxu0 %v974_v31  ;;  %v192_v33 = vld [vmem:[#allocation2 + $0x58] sm:$0x1] }
 0x11d   : > { %v352_v7 = vsel %vm312_vm2, %v290_v36, %v777_v4  ;;  %926 = vmatpush3.bf16.msra.mxu0 %v974_v31  ;;  %v361_v34 = vunpack.c.l.bf16 %v192_v33  ;;  %v209_v33 = vld [vmem:[#allocation2 + $0xa0] sm:$0x1] }
 0x11e   : > { %v350_v9 = vsel %vm310_vm4, %v282_v39, %v775_v5  ;;  %v358_v10 = vpack.c.bf16 %v352_v7, %v351_v6  ;;  %927 = vmatprep.subr.bf16.mxu0 %v975_v32 }
 0x11f   : > { %v357_v11 = vpack.c.bf16 %v350_v9, %v349_v8  ;;  %v365_v35 = vrot.slane %v361_v34, %v1126_v28  ;;  %v531_v34 = vunpack.c.l.bf16 %v209_v33 }
 0x120   : > { %v985_v12 = vpop.eup %984 }
 0x121   : > { %v987_v13 = vpop.eup %986  ;;  %v780_v14 = vadd.f32 -1.0, %v985_v12  ;;  %905 = vmatprep.mubr.bf16.mxu1 %v357_v11  ;;  %928 = vmatpush3.bf16.msra.mxu0 %v975_v32 }
 0x122   : > { %v989_v15 = vpop.eup %988  ;;  %v778_v16 = vadd.f32 -1.0, %v987_v13  ;;  %906 = vmatmul.mubr.bf16.vlgmr.msra.gmra.mrb[0].mxu1 %v358_v10 }
 0x123   : > { %v991_v17 = vpop.eup %990  ;;  %v781_v18 = vadd.f32 -1.0, %v989_v15  ;;  %v355_v20 = vsel %vm315_vm5, %v303_v47, %v780_v14 }
 0x124   : > { %v779_v19 = vadd.f32 -1.0, %v991_v17  ;;  %v353_v22 = vsel %vm313_vm7, %v295_v49, %v778_v16 }
 0x125   : > { %v356_v21 = vsel %vm316_vm6, %v306_v52, %v781_v18 }
 0x126   : > { %v354_v23 = vsel %vm314_vm8, %v298_v55, %v779_v19  ;;  %v360_v24 = vpack.c.bf16 %v356_v21, %v355_v20 }
 0x127   : > { %v359_v25 = vpack.c.bf16 %v354_v23, %v353_v22 }
 0x129   : > { %909 = vmatprep.mubr.bf16.mxu1 %v359_v25 }
 0x12a   : > { %910 = vmatmul.mubr.bf16.gmra.mrb[4].mxu1 %v360_v24 }
 0x1f5   : > { %v907_v36 = vpop.f32.mrb[0].mxu1 }
 0x1f6   : > { %v457_v37 = vadd.f32 %v907_v36, %v365_v35  ;;  %v448_v38 = vpop.f32.mrb[1].mxu1 }
 0x1f7   : > { %v449_v39 = vadd.f32 %v448_v38, %v365_v35  ;;  %v908_v40 = vpop.f32.mrb[2].mxu1 }
 0x1f8   : > { %v489_v41 = vmin.f32 %v457_v37, 0.0  ;;  %v460_v42 = vadd.f32 %v908_v40, %v365_v35  ;;  %v451_v43 = vpop.f32.mrb[3].mxu1  ;;  %vm481_vm9 = vcmp.gt.f32.partialorder %v457_v37, 0.0 }
 0x1f9   : > { %v487_v44 = vmin.f32 %v449_v39, 0.0  ;;  %v452_v45 = vadd.f32 %v451_v43, %v365_v35  ;;  %vm479_vm11 = vcmp.gt.f32.partialorder %v449_v39, 0.0 }
 0x1fa   : > { %v499_v46 = vmul.f32 1.442695, %v489_v41  ;;  %v490_v47 = vmin.f32 %v460_v42, 0.0  ;;  %vm482_vm10 = vcmp.gt.f32.partialorder %v460_v42, 0.0 }
 0x1fb   : > { %v495_v48 = vmul.f32 1.442695, %v487_v44  ;;  %v488_v49 = vmin.f32 %v452_v45, 0.0  ;;  %vm480_vm12 = vcmp.gt.f32.partialorder %v452_v45, 0.0 }
 0x1fc   : > { %992 = vpow2.f32 %v499_v46  ;;  %v501_v50 = vmul.f32 1.442695, %v490_v47 }
 0x1fd   : > { %994 = vpow2.f32 %v495_v48  ;;  %v497_v51 = vmul.f32 1.442695, %v488_v49  ;;  %v911_v52 = vpop.f32.mrb[4].mxu1 }
 0x1fe   : > { %996 = vpow2.f32 %v501_v50  ;;  %v473_v53 = vadd.f32 %v911_v52, %v365_v35  ;;  %v464_v54 = vpop.f32.mrb[5].mxu1 }
 0x1ff   : > { %998 = vpow2.f32 %v497_v51  ;;  %v465_v55 = vadd.f32 %v464_v54, %v365_v35  ;;  %v912_v56 = vpop.f32.mrb[6].mxu1 }
 0x200   : > { %v493_v57 = vmin.f32 %v473_v53, 0.0  ;;  %v476_v58 = vadd.f32 %v912_v56, %v365_v35  ;;  %v467_v59 = vpop.f32.mrb[7].mxu1  ;;  %vm485_vm13 = vcmp.gt.f32.partialorder %v473_v53, 0.0 }
 0x201   : > { %v491_v60 = vmin.f32 %v465_v55, 0.0  ;;  %v468_v61 = vadd.f32 %v467_v59, %v365_v35  ;;  %vm483_vm15 = vcmp.gt.f32.partialorder %v465_v55, 0.0  ;;  %v535_v35 = vrot.slane %v531_v34, %v1126_v28 }
 0x202   : > { %v507_v62 = vmul.f32 1.442695, %v493_v57  ;;  %v494_v63 = vmin.f32 %v476_v58, 0.0  ;;  %vm486_vm14 = vcmp.gt.f32.partialorder %v476_v58, 0.0 }
 0x203   : > { %v503_v0 = vmul.f32 1.442695, %v491_v60  ;;  %v492_v1 = vmin.f32 %v468_v61, 0.0  ;;  %vm484_vm0 = vcmp.gt.f32.partialorder %v468_v61, 0.0 }
 0x204   : > { %1000 = vpow2.f32 %v507_v62  ;;  %v509_v2 = vmul.f32 1.442695, %v494_v63 }
 0x205   : > { %1002 = vpow2.f32 %v503_v0  ;;  %v505_v3 = vmul.f32 1.442695, %v492_v1 }
 0x206   : > { %v993_v4 = vpop.eup %992  ;;  %1004 = vpow2.f32 %v509_v2 }
 0x207   : > { %v995_v5 = vpop.eup %994  ;;  %v792_v6 = vadd.f32 -1.0, %v993_v4  ;;  %1006 = vpow2.f32 %v505_v3 }
 0x208   : > { %v997_v7 = vpop.eup %996  ;;  %v790_v8 = vadd.f32 -1.0, %v995_v5 }
 0x209   : > { %v999_v9 = vpop.eup %998  ;;  %v793_v10 = vadd.f32 -1.0, %v997_v7  ;;  %v521_v12 = vsel %vm481_vm9, %v457_v37, %v792_v6 }
 0x20a   : > { %v791_v11 = vadd.f32 -1.0, %v999_v9  ;;  %v519_v15 = vsel %vm479_vm11, %v449_v39, %v790_v8 }
 0x20b   : > { %v522_v13 = vsel %vm482_vm10, %v460_v42, %v793_v10 }
 0x20c   : > { %v528_v14 = vpack.c.bf16 %v522_v13, %v521_v12  ;;  %v520_v16 = vsel %vm480_vm12, %v452_v45, %v791_v11 }
 0x20d   : > { %v527_v17 = vpack.c.bf16 %v520_v16, %v519_v15 }
 0x20e   : > { %v1001_v18 = vpop.eup %1000 }
 0x20f   : > { %v1003_v19 = vpop.eup %1002  ;;  %v796_v20 = vadd.f32 -1.0, %v1001_v18  ;;  %929 = vmatprep.mubr.bf16.mxu0 %v527_v17 }
 0x210   : > { %v1005_v21 = vpop.eup %1004  ;;  %v794_v22 = vadd.f32 -1.0, %v1003_v19  ;;  %930 = vmatmul.mubr.bf16.vlgmr.msra.gmra.mrb[8].mxu0 %v528_v14 }
 0x211   : > { %v1007_v23 = vpop.eup %1006  ;;  %v797_v24 = vadd.f32 -1.0, %v1005_v21  ;;  %v525_v26 = vsel %vm485_vm13, %v473_v53, %v796_v20 }
 0x212   : > { %v795_v25 = vadd.f32 -1.0, %v1007_v23  ;;  %v523_v29 = vsel %vm483_vm15, %v465_v55, %v794_v22 }
 0x213   : > { %v526_v27 = vsel %vm486_vm14, %v476_v58, %v797_v24 }
 0x214   : > { %v524_v30 = vsel %vm484_vm0, %v468_v61, %v795_v25  ;;  %v530_v31 = vpack.c.bf16 %v526_v27, %v525_v26 }
 0x215   : > { %v529_v32 = vpack.c.bf16 %v524_v30, %v523_v29 }
 0x217   : > { %933 = vmatprep.mubr.bf16.mxu0 %v529_v32 }
 0x218   : > { %934 = vmatmul.mubr.bf16.gmra.mrb[12].mxu0 %v530_v31 }
 0x2e3   : > { %v931_v36 = vpop.f32.mrb[8].mxu0 }
 0x2e4   : > { %v618_v37 = vpop.f32.mrb[9].mxu0  ;;  %v627_v39 = vadd.f32 %v931_v36, %v535_v35 }
 0x2e5   : > { %v932_v38 = vpop.f32.mrb[10].mxu0  ;;  %v619_v42 = vadd.f32 %v618_v37, %v535_v35 }
 0x2e6   : > { %v630_v40 = vadd.f32 %v932_v38, %v535_v35  ;;  %v621_v41 = vpop.f32.mrb[11].mxu0 }
 0x2e7   : > { %v622_v43 = vadd.f32 %v621_v41, %v535_v35 }
 0x2e8   : > { %v832_v44 = vpack.c.bf16 %v630_v40, %v627_v39 }
 0x2e9   : > { %v827_v45 = vpack.c.bf16 %v622_v43, %v619_v42 }
 0x2ea   : > { %844 = vst [vmem:[%s160_s8 + $0x8] sm:$0xff] %v832_v44  }
 0x2eb   : > { %828 = vst [vmem:[%s160_s8] sm:$0xff] %v827_v45   ;;  %v935_v46 = vpop.f32.mrb[12].mxu0 }
 0x2ec   : > { %v634_v47 = vpop.f32.mrb[13].mxu0  ;;  %v643_v48 = vadd.f32 %v935_v46, %v535_v35 }
 0x2ed   : > { %v936_v28 = vpop.f32.mrb[14].mxu0  ;;  %v635_v51 = vadd.f32 %v634_v47, %v535_v35 }
 0x2ee   : > { %v646_v49 = vadd.f32 %v936_v28, %v535_v35  ;;  %v637_v50 = vpop.f32.mrb[15].mxu0 }
 0x2ef   : > { %v638_v52 = vadd.f32 %v637_v50, %v535_v35 }
 0x2f0   : > { %v842_v53 = vpack.c.bf16 %v646_v49, %v643_v48 }
 0x2f1   : > { %v837_v54 = vpack.c.bf16 %v638_v52, %v635_v51 }
 0x2f2   : > { %846 = vst [vmem:[%s160_s8 + $0x18] sm:$0xff] %v842_v53  }
 0x2f3   : > { %845 = vst [vmem:[%s160_s8 + $0x10] sm:$0xff] %v837_v54  }
 0x2f4 PF: > { %s13_s9 = sadd.s32 1, %s1046_s9  }
 0x2f5   : > { %p10_p3 = scmp.ge.s32.totalorder %s13_s9, 4  }
 0x2f7   :  { %12 = sbr.rel (!%p10_p3) target bundleno = 1 (0x1), region = 63 }
 0x2fe   :  { %711 = vsyncpa [#allocation3], 1 }
 0x2ff   :  { %713 = vsyncpa [#allocation3 + $0x1], 1 }

</bundles_post_ra>
